<compile_context>
chip_gen: v7x
topology: tpu7x:2x2x1
jax: 0.10.0
libtpu: 0.0.40
codegen_flags: <defaults>
</compile_context>

<pallas_src>
import jax
import jax.numpy as jnp
from jax.experimental import pallas as pl
from jax.experimental.pallas import tpu as pltpu


_VMEM_SPEC = pl.BlockSpec(memory_space=pltpu.MemorySpace.VMEM)


# ---------------------------------------------------------------------------
# JAX glue: im2col with the 4 pool positions and the batch folded into lanes.
# ---------------------------------------------------------------------------
def im2col_pool_lanes(x, ksize=5, pad=2):
    """x: (B, C, H, W) -> (K, 4*B*Np) with K = ksize*ksize*C, Np = (H//2)*(W//2).

    Lane ordering (outer -> inner): pool position q, batch b, pooled spatial s
    (row major).  K ordering is (kh, kw, c), matching _conv_weight_to_mat.
    """
    B, C, H, W = x.shape
    xp = jnp.pad(x, ((0, 0), (0, 0), (pad, pad), (pad, pad)))
    # patches[b, kh*ksize+kw, c, h, w] == x_pad[b, c, h+kh, w+kw]
    patches = jnp.stack(
        [xp[:, :, kh:kh + H, kw:kw + W] for kh in range(ksize) for kw in range(ksize)],
        axis=1,
    )                                                # (B, ksize*ksize, C, H, W)
    K = ksize * ksize * C
    patches = patches.reshape(B, K, H, W)
    # 4 positions of every 2x2 pool window
    groups = jnp.stack(
        [patches[:, :, dy::2, dx::2] for dy in range(2) for dx in range(2)],
        axis=0,
    )                                                # (4, B, K, H//2, W//2)
    groups = jnp.transpose(groups, (2, 0, 1, 3, 4))  # (K, 4, B, H//2, W//2)
    return groups.reshape(K, 4 * B * (H // 2) * (W // 2))


def _conv_weight_to_mat(w):
    """(C_out, C_in, kh, kw) -> (C_out, kh*kw*C_in) matching im2col K ordering."""
    C_out, C_in, kh, kw = w.shape
    return jnp.transpose(w, (0, 2, 3, 1)).reshape(C_out, kh * kw * C_in)


# ---------------------------------------------------------------------------
# Kernel 1: fused conv (single im2col matmul) + 2x2 maxpool + bias + relu
# ---------------------------------------------------------------------------
def _conv_relu_pool_kernel(p_ref, w_ref, b_ref, o_ref):
    # p_ref: (K, 4*S) bf16   w_ref: (C_out, K) bf16   b_ref: (C_out, 1) f32
    # o_ref: (C_out, S) f32,  S = B*Np, lanes within each q-slab ordered [b | s]
    y = jnp.dot(w_ref[...], p_ref[...], preferred_element_type=jnp.float32)  # (C_out, 4*S)
    S = o_ref.shape[1]
    m = y[:, 0:S]
    for q in range(1, 4):                         # max over the 4 pool positions
        m = jnp.maximum(m, y[:, q * S:(q + 1) * S])
    # bias is identical across q -> hoisted after the max; relu commutes with max
    o_ref[...] = jnp.maximum(m + b_ref[...], 0.0)


def conv_relu_pool(patches, w_mat, bias_col, S):
    C_out = w_mat.shape[0]
    return pl.pallas_call(
        _conv_relu_pool_kernel,
        out_shape=jax.ShapeDtypeStruct((C_out, S), jnp.float32),
        in_specs=[_VMEM_SPEC, _VMEM_SPEC, _VMEM_SPEC],
        out_specs=_VMEM_SPEC,
    )(patches, w_mat, bias_col)


# ---------------------------------------------------------------------------
# Kernel 2: conv2 + maxpool + bias + relu with the final Linear fused in
# ---------------------------------------------------------------------------
def _conv_relu_pool_fc_kernel(p_ref, w_ref, b_ref, wf_ref, sel_ref, bf_ref, o_ref):
    # p_ref:  (K, 4*S) bf16          w_ref: (C_out, K) bf16     b_ref: (C_out, 1) f32
    # wf_ref: (C_out, S) f32  (fc weight reshaped to (C_out, Np) and tiled over batch)
    # sel_ref:(S, B) f32      (0/1 selector, sel[b*Np + s, b] = 1)
    # bf_ref: (1, 1) f32             o_ref: (1, B) f32
    y = jnp.dot(w_ref[...], p_ref[...], preferred_element_type=jnp.float32)  # (C_out, 4*S)
    S = wf_ref.shape[1]
    m = y[:, 0:S]
    for q in range(1, 4):
        m = jnp.maximum(m, y[:, q * S:(q + 1) * S])
    z = jnp.maximum(m + b_ref[...], 0.0)                  # (C_out, S) f32
    prod = z * wf_ref[...]                                # fc multiply (VPU, f32)
    col = jnp.sum(prod, axis=0, keepdims=True)            # (1, S) sublane reduce
    o_ref[...] = (
        jnp.dot(col, sel_ref[...], preferred_element_type=jnp.float32) + bf_ref[...]
    )


def conv_relu_pool_fc(patches, w_mat, bias_col, wf_tiled, sel, bf2, B):
    return pl.pallas_call(
        _conv_relu_pool_fc_kernel,
        out_shape=jax.ShapeDtypeStruct((1, B), jnp.float32),
        in_specs=[_VMEM_SPEC] * 6,
        out_specs=_VMEM_SPEC,
    )(patches, w_mat, bias_col, wf_tiled, sel, bf2)


# ---------------------------------------------------------------------------
# CNN0 forward
# ---------------------------------------------------------------------------
@jax.jit
def cnn0_forward(x, w1, b1, w2, b2, wf, bf):
    B, _, H, W = x.shape
    x = x.astype(jnp.float32)
    Hp, Wp = H // 2, W // 2
    Hq, Wq = H // 4, W // 4
    Np1, Np2 = Hp * Wp, Hq * Wq
    C1, C2 = w1.shape[0], w2.shape[0]

    # conv1 (1 -> 16, 5x5, pad 2) + relu + maxpool2 : one (16,25)@(25,4*B*Np1) pass
    p1 = im2col_pool_lanes(x).astype(jnp.bfloat16)               # (25, 4*B*Np1)
    w1m = _conv_weight_to_mat(w1).astype(jnp.bfloat16)           # (16, 25)
    y1 = conv_relu_pool(p1, w1m, b1.reshape(C1, 1).astype(jnp.float32), B * Np1)
    y1_nchw = jnp.transpose(y1.reshape(C1, B, Hp, Wp), (1, 0, 2, 3))   # (B,16,H/2,W/2)

    # conv2 (16 -> 32, 5x5, pad 2) + relu + maxpool2 + fc, all fused in one kernel
    p2 = im2col_pool_lanes(y1_nchw).astype(jnp.bfloat16)         # (400, 4*B*Np2)
    w2m = _conv_weight_to_mat(w2).astype(jnp.bfloat16)           # (32, 400)
    # fc weight in NCHW flatten order: wf[0, c*Np2 + s] -> (C2, Np2), tiled over batch lanes
    wf_tiled = jnp.tile(wf.reshape(C2, Np2), (1, B)).astype(jnp.float32)      # (C2, B*Np2)
    sel = (jnp.arange(B * Np2)[:, None] // Np2 == jnp.arange(B)[None, :]).astype(jnp.float32)
    out = conv_relu_pool_fc(
        p2, w2m, b2.reshape(C2, 1).astype(jnp.float32),
        wf_tiled, sel, bf.reshape(1, 1).astype(jnp.float32), B,
    )                                                            # (1, B)
    return out.reshape(B, 1)


# ---------------------------------------------------------------------------
# Pure-JAX reference (for correctness check only)
# ---------------------------------------------------------------------------
def ref_forward(x, w1, b1, w2, b2, wf, bf, quantize_like_kernel=False):
    """With quantize_like_kernel=True, rounds the matmul inputs to bf16 exactly
    where the Pallas path does, so it matches the kernels to accumulation noise."""
    hi = jax.lax.Precision.HIGHEST
    q = (lambda a: a.astype(jnp.bfloat16).astype(jnp.float32)) if quantize_like_kernel \
        else (lambda a: a)
    dn = ("NCHW", "OIHW", "NCHW")
    y = jax.lax.conv_general_dilated(q(x), q(w1), (1, 1), ((2, 2), (2, 2)),
                                     dimension_numbers=dn, precision=hi)
    y = jax.nn.relu(y + b1.reshape(1, -1, 1, 1))
    y = jax.lax.reduce_window(y, -jnp.inf, jax.lax.max, (1, 1, 2, 2), (1, 1, 2, 2), "VALID")
    y = jax.lax.conv_general_dilated(q(y), q(w2), (1, 1), ((2, 2), (2, 2)),
                                     dimension_numbers=dn, precision=hi)
    y = jax.nn.relu(y + b2.reshape(1, -1, 1, 1))
    y = jax.lax.reduce_window(y, -jnp.inf, jax.lax.max, (1, 1, 2, 2), (1, 1, 2, 2), "VALID")
    y = y.reshape(y.shape[0], -1)
    return jnp.dot(y, wf.T, precision=hi) + bf


if __name__ == "__main__":
    L = 16           # spatial size (must be divisible by 4)
    B = 2            # batch

    key = jax.random.PRNGKey(0)
    k_x, k_w1, k_b1, k_w2, k_b2, k_wf, k_bf = jax.random.split(key, 7)

    x = jax.random.normal(k_x, (B, 1, L, L), dtype=jnp.float32)

    # deterministic synthetic parameters (shapes from CNN0.__init__)
    w1 = 0.1 * jax.random.normal(k_w1, (16, 1, 5, 5), dtype=jnp.float32)
    b1 = 0.1 * jax.random.normal(k_b1, (16,), dtype=jnp.float32)
    w2 = 0.1 * jax.random.normal(k_w2, (32, 16, 5, 5), dtype=jnp.float32)
    b2 = 0.1 * jax.random.normal(k_b2, (32,), dtype=jnp.float32)
    Ffc = 32 * (L // 4) * (L // 4)
    wf = 0.1 * jax.random.normal(k_wf, (1, Ffc), dtype=jnp.float32)
    bf = 0.1 * jax.random.normal(k_bf, (1,), dtype=jnp.float32)

    out = jax.block_until_ready(cnn0_forward(x, w1, b1, w2, b2, wf, bf))
    assert out.shape == (B, 1), out.shape

    # tight check vs a reference with the same bf16 input rounding as the kernels
    ref_q = ref_forward(x, w1, b1, w2, b2, wf, bf, quantize_like_kernel=True)
    assert jnp.allclose(out, ref_q, rtol=2e-3, atol=2e-3), (out, ref_q)
    # loose sanity check vs the exact f32 module semantics (bf16 MXU inputs)
    ref = ref_forward(x, w1, b1, w2, b2, wf, bf)
    assert jnp.allclose(out, ref, rtol=5e-2, atol=1e-1), (out, ref)

    print("KERNEL_OK")
</pallas_src>

<mosaic_0001>
module attributes {stable_mosaic.version = 11 : i64} {
  func.func @_conv_relu_pool_kernel(%arg0: memref<25x512xbf16, #tpu.memory_space<vmem>>, %arg1: memref<16x25xbf16, #tpu.memory_space<vmem>>, %arg2: memref<16x1xf32, #tpu.memory_space<vmem>>, %arg3: memref<16x128xf32, #tpu.memory_space<vmem>>) attributes {dimension_semantics = [], scalar_prefetch = 0 : i64, scratch_operands = 0 : i64, tpu.core_type = #tpu.core_type<tc>} {
    %c0 = arith.constant 0 : index
    %c0_0 = arith.constant 0 : index
    %0 = vector.load %arg1[%c0, %c0_0] : memref<16x25xbf16, #tpu.memory_space<vmem>>, vector<16x25xbf16>
    %c0_1 = arith.constant 0 : index
    %c0_2 = arith.constant 0 : index
    %1 = vector.load %arg0[%c0_1, %c0_2] : memref<25x512xbf16, #tpu.memory_space<vmem>>, vector<25x512xbf16>
    %cst = arith.constant dense<0.000000e+00> : vector<16x512xf32>
    %2 = tpu.matmul %0, %1, %cst {dimension_numbers = #tpu.dot_dimension_numbers<[1], [0], [0], [1], [0, 0, 1, 1], [], []>} : vector<16x25xbf16>, vector<25x512xbf16>, vector<16x512xf32> -> vector<16x512xf32>
    %3 = vector.extract_strided_slice %2 {offsets = [0, 0], sizes = [16, 128], strides = [1, 1]} : vector<16x512xf32> to vector<16x128xf32>
    %4 = vector.extract_strided_slice %2 {offsets = [0, 128], sizes = [16, 128], strides = [1, 1]} : vector<16x512xf32> to vector<16x128xf32>
    %5 = arith.maximumf %3, %4 : vector<16x128xf32>
    %6 = vector.extract_strided_slice %2 {offsets = [0, 256], sizes = [16, 128], strides = [1, 1]} : vector<16x512xf32> to vector<16x128xf32>
    %7 = arith.maximumf %5, %6 : vector<16x128xf32>
    %8 = vector.extract_strided_slice %2 {offsets = [0, 384], sizes = [16, 128], strides = [1, 1]} : vector<16x512xf32> to vector<16x128xf32>
    %9 = arith.maximumf %7, %8 : vector<16x128xf32>
    %c0_3 = arith.constant 0 : index
    %c0_4 = arith.constant 0 : index
    %10 = vector.load %arg2[%c0_3, %c0_4] : memref<16x1xf32, #tpu.memory_space<vmem>>, vector<16x1xf32>
    %11 = vector.broadcast %10 : vector<16x1xf32> to vector<16x128xf32>
    %12 = arith.addf %9, %11 : vector<16x128xf32>
    %cst_5 = arith.constant 0.000000e+00 : f32
    %13 = vector.broadcast %cst_5 : f32 to vector<16x128xf32>
    %14 = arith.maximumf %12, %13 : vector<16x128xf32>
    %c0_6 = arith.constant 0 : index
    %c0_7 = arith.constant 0 : index
    %15 = vector.load %arg3[%c0_6, %c0_7] : memref<16x128xf32, #tpu.memory_space<vmem>>, vector<16x128xf32>
    tpu.vector_store %arg3[%c0_6, %c0_7], %14 {strides = array<i32>} : memref<16x128xf32, #tpu.memory_space<vmem>>, vector<16x128xf32>,
    return
  }
}

module attributes {stable_mosaic.version = 11 : i64} {
  func.func @_conv_relu_pool_fc_kernel(%arg0: memref<400x128xbf16, #tpu.memory_space<vmem>>, %arg1: memref<32x400xbf16, #tpu.memory_space<vmem>>, %arg2: memref<32x1xf32, #tpu.memory_space<vmem>>, %arg3: memref<32x32xf32, #tpu.memory_space<vmem>>, %arg4: memref<32x2xf32, #tpu.memory_space<vmem>>, %arg5: memref<1x1xf32, #tpu.memory_space<vmem>>, %arg6: memref<1x2xf32, #tpu.memory_space<vmem>>) attributes {dimension_semantics = [], scalar_prefetch = 0 : i64, scratch_operands = 0 : i64, tpu.core_type = #tpu.core_type<tc>} {
    %c0 = arith.constant 0 : index
    %c0_0 = arith.constant 0 : index
    %0 = vector.load %arg1[%c0, %c0_0] : memref<32x400xbf16, #tpu.memory_space<vmem>>, vector<32x400xbf16>
    %c0_1 = arith.constant 0 : index
    %c0_2 = arith.constant 0 : index
    %1 = vector.load %arg0[%c0_1, %c0_2] : memref<400x128xbf16, #tpu.memory_space<vmem>>, vector<400x128xbf16>
    %cst = arith.constant dense<0.000000e+00> : vector<32x128xf32>
    %2 = tpu.matmul %0, %1, %cst {dimension_numbers = #tpu.dot_dimension_numbers<[1], [0], [0], [1], [0, 0, 1, 1], [], []>} : vector<32x400xbf16>, vector<400x128xbf16>, vector<32x128xf32> -> vector<32x128xf32>
    %3 = vector.extract_strided_slice %2 {offsets = [0, 0], sizes = [32, 32], strides = [1, 1]} : vector<32x128xf32> to vector<32x32xf32>
    %4 = vector.extract_strided_slice %2 {offsets = [0, 32], sizes = [32, 32], strides = [1, 1]} : vector<32x128xf32> to vector<32x32xf32>
    %5 = arith.maximumf %3, %4 : vector<32x32xf32>
    %6 = vector.extract_strided_slice %2 {offsets = [0, 64], sizes = [32, 32], strides = [1, 1]} : vector<32x128xf32> to vector<32x32xf32>
    %7 = arith.maximumf %5, %6 : vector<32x32xf32>
    %8 = vector.extract_strided_slice %2 {offsets = [0, 96], sizes = [32, 32], strides = [1, 1]} : vector<32x128xf32> to vector<32x32xf32>
    %9 = arith.maximumf %7, %8 : vector<32x32xf32>
    %c0_3 = arith.constant 0 : index
    %c0_4 = arith.constant 0 : index
    %10 = vector.load %arg2[%c0_3, %c0_4] : memref<32x1xf32, #tpu.memory_space<vmem>>, vector<32x1xf32>
    %11 = vector.broadcast %10 : vector<32x1xf32> to vector<32x32xf32>
    %12 = arith.addf %9, %11 : vector<32x32xf32>
    %cst_5 = arith.constant 0.000000e+00 : f32
    %13 = vector.broadcast %cst_5 : f32 to vector<32x32xf32>
    %14 = arith.maximumf %12, %13 : vector<32x32xf32>
    %c0_6 = arith.constant 0 : index
    %c0_7 = arith.constant 0 : index
    %15 = vector.load %arg3[%c0_6, %c0_7] : memref<32x32xf32, #tpu.memory_space<vmem>>, vector<32x32xf32>
    %16 = arith.mulf %14, %15 : vector<32x32xf32>
    %cst_8 = arith.constant dense<0.000000e+00> : vector<32xf32>
    %17 = vector.multi_reduction <add>, %16, %cst_8 [0] : vector<32x32xf32> to vector<32xf32>
    %18 = vector.shape_cast %17 : vector<32xf32> to vector<1x32xf32>
    %c0_9 = arith.constant 0 : index
    %c0_10 = arith.constant 0 : index
    %19 = vector.load %arg4[%c0_9, %c0_10] : memref<32x2xf32, #tpu.memory_space<vmem>>, vector<32x2xf32>
    %cst_11 = arith.constant dense<0.000000e+00> : vector<1x2xf32>
    %20 = tpu.matmul %18, %19, %cst_11 {dimension_numbers = #tpu.dot_dimension_numbers<[1], [0], [0], [1], [0, 0, 1, 1], [], []>} : vector<1x32xf32>, vector<32x2xf32>, vector<1x2xf32> -> vector<1x2xf32>
    %c0_12 = arith.constant 0 : index
    %c0_13 = arith.constant 0 : index
    %21 = vector.load %arg5[%c0_12, %c0_13] : memref<1x1xf32, #tpu.memory_space<vmem>>, vector<1x1xf32>
    %22 = vector.broadcast %21 : vector<1x1xf32> to vector<1x2xf32>
    %23 = arith.addf %20, %22 : vector<1x2xf32>
    %c0_14 = arith.constant 0 : index
    %c0_15 = arith.constant 0 : index
    %24 = vector.load %arg6[%c0_14, %c0_15] : memref<1x2xf32, #tpu.memory_space<vmem>>, vector<1x2xf32>
    tpu.vector_store %arg6[%c0_14, %c0_15], %23 {strides = array<i32>} : memref<1x2xf32, #tpu.memory_space<vmem>>, vector<1x2xf32>,
    return
  }
}

</mosaic_0001>

<bundles_post_ra>
// kernel: cnn0_forward.2
= control target key start
LH: loop header
LB: loop body
LE: loop exit
PB: predicated region body
PF: predicated region fallthrough
CT: control target
= control target key end

     0   :  { %vm70_vm0 = vcmask 1043456   ;;  %vm71_vm1 = vcmask 1044480   ;;  %v227_v1 = vmov 65535   ;;  %v228_v3 = vmov 0   ;;  %s288_s0 = inlined_call_operand.vmem [shape: bf16[25,512], index: 0, kind: input, shape index: {}]   ;;  %s289_s2 = inlined_call_operand.vmem [shape: f32[16,1], index: 2, kind: input, shape index: {}]   ;;  %s290_s1 = inlined_call_operand.vmem [shape: bf16[16,25], index: 1, kind: input, shape index: {}]   ;;  %s291_s3 = inlined_call_operand.vmem [shape: f32[16,128], index: 3, kind: output, shape index: {}]  }
   0x1   :  { %v214_v0 = vld [vmem:[%s288_s0 + $0x4] ss:$16 sps:$4 sm:$0xff]   ;;  %v72_v2 = vsel %vm70_vm0, 4294967295, %v227_v1  ;;  %118 = vmatprep.mubr.bf16.mxu0 %v228_v3  ;;  %161 = vmatprep.mubr.bf16.mxu1 %v228_v3  ;;  %v216_v4 = vld [vmem:[%s288_s0 + $0xc] ss:$16 sps:$4 sm:$0xff]   ;;  %vm66_vm2 = vcmask 203776  }
   0x2   :  { %213 = vset.pattern.permute.xlu0 %v228_v3  ;;  %86 = vmatprep.subr.bf16.mxu0 %v214_v0  ;;  %v218_v5 = vld [vmem:[%s288_s0] ss:$16 sps:$4 sm:$0xff]   ;;  %v219_v6 = vld [vmem:[%s288_s0 + $0x8] ss:$16 sps:$4 sm:$0xff]   ;;  %v73_v7 = vsel %vm71_vm1, %v72_v2, 0 }
   0x3   :  { %129 = vmatprep.subr.bf16.mxu1 %v216_v4  ;;  %v220_v8 = vld [vmem:[%s288_s0 + $0x24] ss:$16 sps:$4 sm:$0x1f]   ;;  %87 = vmatpush1.bf16.msra.mxu0 %v218_v5  ;;  %v222_v9 = vld [vmem:[%s288_s0 + $0x2c] ss:$16 sps:$4 sm:$0x1f]  }
   0x4   :  { %130 = vmatpush1.bf16.msra.mxu1 %v219_v6  ;;  %v78_v10 = vand.u32 %v220_v8, %v73_v7  ;;  %v224_v11 = vld [vmem:[%s288_s0 + $0x20] ss:$16 sps:$4 sm:$0x1f]   ;;  %v225_v12 = vld [vmem:[%s288_s0 + $0x28] ss:$16 sps:$4 sm:$0x1f]   ;;  %v84_v13 = vand.u32 %v222_v9, %v73_v7 }
   0x5   :  { %v178_v14 = vld [vmem:[%s289_s2] sm:$0xff]  ;;  %v75_v15 = vand.u32 %v224_v11, %v73_v7  ;;  %v81_v16 = vand.u32 %v225_v12, %v73_v7  ;;  %v179_v18 = vld [vmem:[%s289_s2 + $0x8] sm:$0xff] }
   0x6   :  { %88 = vmatprep.subr.bf16.mxu0 %v78_v10  ;;  %182 = vperm.xlu0 %213, %v178_v14   ;;  %v226_v17 = vld [vmem:[%s290_s1] sm:$0xff]  }
   0x7   :  { %131 = vmatprep.subr.bf16.mxu1 %v84_v13  ;;  %89 = vmatpush1.bf16.msra.mxu0 %v75_v15 }
   0x8   :  { %132 = vmatpush1.bf16.msra.mxu1 %v81_v16 }
   0xa   :  { %187 = vperm.xlu0 %213, %v179_v18   ;;  %209 = vmatmul.mubr.msk.bf16.vlgmr.msra.gmra.mrb[0].mxu0 %vm66_vm2, %v226_v17 }
   0xb   :  { %210 = vmatmul.mubr.msk.bf16.vlgmr.msra.gmra.mrb[0].mxu1 %vm66_vm2, %v226_v17 }
  0x85   :  { %v183_v19 = vpop.permute.xlu0 %182 }
  0x89   :  { %v188_v35 = vpop.permute.xlu0 %187 }
  0xdd   :  { %v120_v20 = vpop.f32.mrb[0].mxu0 }
  0xde   :  { %v163_v21 = vpop.f32.mrb[0].mxu1  ;;  %v122_v22 = vpop.f32.mrb[1].mxu0 }
  0xdf   :  { %v165_v23 = vpop.f32.mrb[1].mxu1  ;;  %v172_v24 = vmax.f32 %v120_v20, %v122_v22  ;;  %v124_v25 = vpop.f32.mrb[2].mxu0 }
  0xe0   :  { %v167_v26 = vpop.f32.mrb[2].mxu1  ;;  %v126_v27 = vpop.f32.mrb[3].mxu0 }
  0xe1   :  { %v169_v28 = vpop.f32.mrb[3].mxu1  ;;  %v174_v29 = vmax.f32 %v172_v24, %v163_v21  ;;  %v173_v30 = vmax.f32 %v124_v25, %v126_v27 }
  0xe3   :  { %v176_v31 = vmax.f32 %v174_v29, %v165_v23  ;;  %v175_v32 = vmax.f32 %v173_v30, %v167_v26 }
  0xe5   :  { %v190_v33 = vadd.f32 %v183_v19, %v176_v31  ;;  %v177_v34 = vmax.f32 %v175_v32, %v169_v28 }
  0xe7   :  { %v192_v36 = vmax.f32 %v190_v33, 0.0  ;;  %v191_v37 = vadd.f32 %v188_v35, %v177_v34 }
  0xe9   :  { %v193_v38 = vmax.f32 %v191_v37, 0.0  ;;  %194 = vst [vmem:[%s291_s3] sm:$0xff] %v192_v36 }
  0xeb   :  { %195 = vst [vmem:[%s291_s3 + $0x8] sm:$0xff] %v193_v38 }

// kernel: cnn0_forward.3
= control target key start
LH: loop header
LB: loop body
LE: loop exit
PB: predicated region body
PF: predicated region fallthrough
CT: control target
= control target key end

     0   :  { %s953_s0 = inlined_call_operand.vmem [shape: bf16[400,128], index: 0, kind: input, shape index: {}]   ;;  %s954_s1 = inlined_call_operand.vmem [shape: bf16[32,400], index: 1, kind: input, shape index: {}]   ;;  %s955_s2 = inlined_call_operand.vmem [shape: f32[32,1], index: 2, kind: input, shape index: {}]   ;;  %s956_s3 = inlined_call_operand.vmem [shape: f32[32,32], index: 3, kind: input, shape index: {}]   ;;  %s957_s4 = inlined_call_operand.vmem [shape: f32[32,2], index: 4, kind: input, shape index: {}]   ;;  %s958_s5 = inlined_call_operand.<no memory space> [shape: f32[1,1], index: 5, kind: input, shape index: {}]   ;;  %s959_s6 = inlined_call_operand.hbm [shape: f32[1,2], index: 6, kind: output, shape index: {}]  }
   0x1   :  { %v11_v0 = vstv %s958_s5 }
   0x2   :  { %12 = vst [vmem:[#allocation2] sm:$0x1] %v11_v0 }
   0x3   :  { %v682_v1 = vld [vmem:[%s953_s0 + $0x40] sm:$0xff]   ;;  %v743_v2 = vmov 0   ;;  %v685_v5 = vld [vmem:[%s953_s0 + $0x48] sm:$0xff]   ;;  %v688_v8 = vld [vmem:[%s953_s0 + $0x50] sm:$0xff]   ;;  %vm273_vm0 = vcmask 130048  }
   0x4   :  { %329 = vmatprep.subr.bf16.mxu1 %v743_v2  ;;  %v683_v3 = vld [vmem:[%s953_s0 + $0x80] sm:$0xff]   ;;  %681 = vset.pattern.permute.xlu0 %v743_v2  ;;  %v686_v6 = vld [vmem:[%s953_s0 + $0x88] sm:$0xff]   ;;  %v689_v9 = vld [vmem:[%s953_s0 + $0x90] sm:$0xff]  }
   0x5   :  { %623 = vmatprep.subr.bf16.mxu0 %v682_v1  ;;  %v684_v4 = vld [vmem:[%s953_s0] sm:$0xff]   ;;  %330 = vmatpush1.bf16.msra.mxu1 %v683_v3  ;;  %v687_v7 = vld [vmem:[%s953_s0 + $0x8] sm:$0xff]   ;;  %v690_v10 = vld [vmem:[%s953_s0 + $0x10] sm:$0xff]  }
   0x6   :  { %624 = vmatpush3.bf16.msra.mxu0 %v684_v4  ;;  %331 = vmatprep.subr.bf16.mxu1 %v743_v2  ;;  %v691_v11 = vld [vmem:[%s953_s0 + $0x58] sm:$0xff]   ;;  %v694_v14 = vld [vmem:[%s953_s0 + $0x60] sm:$0xff]   ;;  %v697_v17 = vld [vmem:[%s953_s0 + $0x68] sm:$0xff]  }
   0x7   :  { %625 = vmatprep.subr.bf16.mxu0 %v685_v5  ;;  %v692_v12 = vld [vmem:[%s953_s0 + $0x98] sm:$0xff]   ;;  %v695_v15 = vld [vmem:[%s953_s0 + $0xa0] sm:$0xff]   ;;  %v698_v18 = vld [vmem:[%s953_s0 + $0xa8] sm:$0xff]  }
   0x8   :  { %v693_v13 = vld [vmem:[%s953_s0 + $0x18] sm:$0xff]   ;;  %v696_v16 = vld [vmem:[%s953_s0 + $0x20] sm:$0xff]   ;;  %v699_v19 = vld [vmem:[%s953_s0 + $0x28] sm:$0xff]  }
   0x9   :  { %332 = vmatpush1.bf16.msra.mxu1 %v686_v6  ;;  %v700_v20 = vld [vmem:[%s953_s0 + $0x70] sm:$0xff]   ;;  %v703_v23 = vld [vmem:[%s953_s0 + $0x78] sm:$0xff]   ;;  %v430_v28 = vld [vmem:[%s955_s2] sm:$0xff] }
   0xa   :  { %626 = vmatpush3.bf16.msra.mxu0 %v687_v7  ;;  %333 = vmatprep.subr.bf16.mxu1 %v743_v2  ;;  %v701_v21 = vld [vmem:[%s953_s0 + $0xb0] sm:$0xff]   ;;  %v704_v25 = vld [vmem:[%s953_s0 + $0xb8] sm:$0xff]   ;;  %v709_v30 = vld [vmem:[%s953_s0 + $0xc0] sm:$0xff]  }
   0xb   :  { %627 = vmatprep.subr.bf16.mxu0 %v688_v8  ;;  %v702_v22 = vld [vmem:[%s953_s0 + $0x30] sm:$0xff]   ;;  %v712_v26 = vld [vmem:[%s954_s1 + $0xc] ss:$16 sps:$4 sm:$0xff]   ;;  %436 = vperm.xlu0 %681, %v430_v28  }
   0xc   :  { %v708_v24 = vld [vmem:[%s954_s1 + $0x4] ss:$16 sps:$4 sm:$0xff]   ;;  %v705_v27 = vld [vmem:[%s953_s0 + $0x38] sm:$0xff]   ;;  %620 = vmatprep.mubr.msk.bf16.mxu1 %vm273_vm0, %v712_v26  ;;  %v706_v29 = vld [vmem:[%s954_s1] ss:$16 sps:$4 sm:$0xff]  }
   0xd   :  { %334 = vmatpush1.bf16.msra.mxu1 %v689_v9  ;;  %312 = vmatprep.mubr.bf16.mxu0 %v708_v24 }
   0xe   :  { %628 = vmatpush3.bf16.msra.mxu0 %v690_v10  ;;  %335 = vmatprep.subr.bf16.mxu1 %v743_v2 }
   0xf   :  { %629 = vmatprep.subr.bf16.mxu0 %v691_v11 }
  0x11   :  { %336 = vmatpush1.bf16.msra.mxu1 %v692_v12 }
  0x12   :  { %630 = vmatpush3.bf16.msra.mxu0 %v693_v13  ;;  %337 = vmatprep.subr.bf16.mxu1 %v743_v2 }
  0x13   :  { %631 = vmatprep.subr.bf16.mxu0 %v694_v14 }
  0x15   :  { %338 = vmatpush1.bf16.msra.mxu1 %v695_v15 }
  0x16   :  { %632 = vmatpush3.bf16.msra.mxu0 %v696_v16  ;;  %339 = vmatprep.subr.bf16.mxu1 %v743_v2 }
  0x17   :  { %633 = vmatprep.subr.bf16.mxu0 %v697_v17 }
  0x19   :  { %340 = vmatpush1.bf16.msra.mxu1 %v698_v18 }
  0x1a   :  { %634 = vmatpush3.bf16.msra.mxu0 %v699_v19  ;;  %341 = vmatprep.subr.bf16.mxu1 %v743_v2 }
  0x1b   :  { %635 = vmatprep.subr.bf16.mxu0 %v700_v20 }
  0x1d   :  { %342 = vmatpush1.bf16.msra.mxu1 %v701_v21 }
  0x1e   :  { %636 = vmatpush3.bf16.msra.mxu0 %v702_v22  ;;  %343 = vmatprep.subr.bf16.mxu1 %v743_v2 }
  0x1f   :  { %637 = vmatprep.subr.bf16.mxu0 %v703_v23 }
  0x21   :  { %344 = vmatpush1.bf16.msra.mxu1 %v704_v25 }
  0x22   :  { %13 = vsyncpa [#allocation4], 0  ;;  %638 = vmatpush3.bf16.msra.mxu0 %v705_v27  ;;  %345 = vmatprep.subr.bf16.mxu1 %v743_v2  ;;  %v713_v31 = vld [vmem:[%s954_s1 + $0x24] ss:$16 sps:$4 sm:$0xff]   ;;  %v431_v32 = vld [vmem:[%s955_s2 + $0x8] sm:$0xff]  ;;  %s745_s21 = smov 96  }
  0x23   :  { %v710_v33 = vld [vmem:[%s954_s1 + $0x8] ss:$16 sps:$4 sm:$0xff]   ;;  %v716_v34 = vld [vmem:[%s954_s1 + $0x2c] ss:$16 sps:$4 sm:$0xff]   ;;  %441 = vperm.xlu0 %681, %v431_v32   ;;  %v432_v35 = vld [vmem:[%s955_s2 + $0x10] sm:$0xff]  ;;  %v747_v3 = vmov 0.0|0.0  }
  0x24   :  { %v715_v36 = vld [vmem:[%s954_s1 + $0x20] ss:$16 sps:$4 sm:$0xff]   ;;  %v433_v37 = vld [vmem:[%s955_s2 + $0x18] sm:$0xff]  ;;  %s744_s2 = smov 64   ;;  %v485_v1 = vld [vmem:[%s957_s4 + $0x8] sm:$0xff]  ;;  %667 = vmatprep.subr.bf16.mxu0 %v747_v3  ;;  %vm748_vm1 = vmmov 0  }
  0x25   :  { %313 = vmatmul.mubr.bf16.vlgmr.msra.gmra.mrb[0].mxu0 %v706_v29  ;;  %346 = vmatpush1.bf16.msra.mxu1 %v709_v30  ;;  %v718_v38 = vld [vmem:[%s954_s1 + $0x28] ss:$16 sps:$4 sm:$0xff]   ;;  %s746_s1 = smov 32   ;;  %v488_v63 = vld [vmem:[#allocation2] sm:$0x1]  ;;  %v486_v4 = vld [vmem:[%s957_s4 + $0x10] sm:$0xff] }
  0x26   :  { %320 = vmatprep.mubr.bf16.mxu0 %v713_v31  ;;  %v484_v0 = vld [vmem:[%s957_s4] sm:$0xff]  ;;  %v487_v5 = vld [vmem:[%s957_s4 + $0x18] sm:$0xff]  ;;  %v749_v7 = vmov 0.0   ;;  %vm470_vm2 = vcmask 261120   ;;  %vm571_vm3 = vcmask 8192  }
  0x27   :  { %446 = vperm.xlu0 %681, %v432_v35   ;;  %v668_v2 = vpack.c.bf16 %v485_v1, %v484_v0  ;;  %v671_v6 = vpack.c.bf16 %v487_v5, %v486_v4  ;;  %v463_v35 = vld [vmem:[%s956_s3 + $0x8] sm:$0xff]  ;;  %v494_v1 = vlaneseq }
  0x28   :  { %362 = vmatmul.mubr.bf16.vlgmr.msra.gmra.mrb[0].mxu1 %v710_v33 }
  0x29   :  { %621 = vmatprep.mubr.msk.bf16.mxu1 %vm273_vm0, %v716_v34  ;;  %669 = vmatpush3.bf16.msra.mxu0 %v668_v2  ;;  %v495_v2 = vshrl.u32 %v494_v1, 7 }
  0x2a   :  { %670 = vmatprep.subr.bf16.mxu0 %v747_v3 }
  0x2b   :  { %451 = vperm.xlu0 %681, %v433_v37   ;;  %v496_v3 = vsub.s32 0, %v495_v2 }
  0x2d   :  { %321 = vmatmul.mubr.bf16.gmra.mrb[4].mxu0 %v715_v36 }
  0x2e   :  { %672 = vmatpush3.bf16.msra.mxu0 %v671_v6  ;;  %664 = vmatprep.mubr.msk.f32.mxu0 %vm748_vm1, %v749_v7 }
  0x30   :  { %370 = vmatmul.mubr.bf16.gmra.mrb[4].mxu1 %v718_v38 }
  0x8a   :  { %v437_v8 = vpop.permute.xlu0 %436 }
  0xa2   :  { %v442_v9 = vpop.permute.xlu0 %441 }
  0xa6   :  { %v447_v10 = vpop.permute.xlu0 %446 }
  0xaa   :  { %v452_v11 = vpop.permute.xlu0 %451 }
  0xf8   :  { %v639_v39 = vpop.f32.mrb[0].mxu0 }
  0xf9   :  { %v640_v40 = vpop.f32.mrb[1].mxu0 }
  0xfa   :  { %v641_v41 = vadd.f32 %v640_v40, %v639_v39  ;;  %v642_v42 = vpop.f32.mrb[2].mxu0  ;;  %v462_v40 = vld [vmem:[%s956_s3] sm:$0xff] }
  0xfb   :  { %v643_v43 = vpop.f32.mrb[3].mxu0  ;;  %v363_v44 = vpop.f32.mrb[0].mxu1 }
  0xfc   :  { %v644_v45 = vadd.f32 %v643_v43, %v642_v42  ;;  %v364_v46 = vadd.f32 %v641_v41, %v363_v44  ;;  %v365_v47 = vpop.f32.mrb[1].mxu1  ;;  %v464_v41 = vld [vmem:[%s956_s3 + $0x10] sm:$0xff] }
  0xfd   :  { %v366_v48 = vpop.f32.mrb[2].mxu1 }
  0xfe   :  { %v367_v49 = vadd.f32 %v644_v45, %v366_v48  ;;  %v368_v50 = vpop.f32.mrb[3].mxu1  ;;  %398 = vrot.lane.b32.xlu0 %v364_v46, %s744_s2  ;;  %382 = vrot.lane.b32.xlu1 %v364_v46, %s745_s21 }
  0xff   :  { %v465_v50 = vld [vmem:[%s956_s3 + $0x18] sm:$0xff]  ;;  %s750_s3 = smov [#allocation3]  }
 0x100   :  { %v645_v51 = vpop.f32.mrb[4].mxu0  ;;  %s579_s0 = sshll.u32 %s750_s3, 4  ;;  %s580_s0 = int_to_ptr.vmem [resolvable:$true] %s579_s0 }
 0x101   :  { %v646_v52 = vpop.f32.mrb[5].mxu0  ;;  %s719_s12 = scalar_lea.vmem %s580_s0, 16  ;;  %s723_s13 = scalar_lea.vmem %s580_s0, 32 }
 0x102   :  { %v647_v53 = vadd.f32 %v646_v52, %v645_v51  ;;  %416 = vrot.lane.b32.xlu0 %v367_v49, %s746_s1  ;;  %414 = vrot.lane.b32.xlu1 %v364_v46, %s746_s1  ;;  %v648_v54 = vpop.f32.mrb[6].mxu0  ;;  %p720_p0 = scmp.ne.s32.totalorder %s580_s0, %s719_s12  ;;  %p724_p1 = scmp.lt.s32.totalorder %s580_s0, %s580_s0 }
 0x103   :  { %v371_v55 = vpop.f32.mrb[4].mxu1  ;;  %v649_v56 = vpop.f32.mrb[7].mxu0  ;;  %p725_p2 = scmp.lt.s32.totalorder %s723_s13, %s719_s12 }
 0x104   :  { %v372_v57 = vadd.f32 %v647_v53, %v371_v55  ;;  %v650_v58 = vadd.f32 %v649_v56, %v648_v54  ;;  %v373_v59 = vpop.f32.mrb[5].mxu1 }
 0x105   :  { %v374_v60 = vpop.f32.mrb[6].mxu1  ;;  %p726_p3 = por %p725_p2, %p724_p1 }
 0x106   :  { %402 = vrot.lane.b32.xlu0 %v372_v57, %s744_s2  ;;  %384 = vrot.lane.b32.xlu1 %v367_v49, %s745_s21  ;;  %v375_v61 = vadd.f32 %v650_v58, %v374_v60  ;;  %v376_v62 = vpop.f32.mrb[7].mxu1 }
 0x107   :  { %p727_p4 = pnand %p726_p3, %p720_p0 }
 0x10a   :  { %418 = vrot.lane.b32.xlu0 %v372_v57, %s746_s1  ;;  %400 = vrot.lane.b32.xlu1 %v367_v49, %s744_s2 }
 0x10e   :  { %491 = vperm.xlu0 %681, %v488_v63   ;;  %386 = vrot.lane.b32.xlu1 %v372_v57, %s745_s21 }
 0x112   :  { %388 = vrot.lane.b32.xlu1 %v375_v61, %s745_s21 }
 0x116   :  { %404 = vrot.lane.b32.xlu1 %v375_v61, %s744_s2 }
 0x11a   :  { %420 = vrot.lane.b32.xlu1 %v375_v61, %s746_s1 }
 0x170   :  { %v383_v12 = vpop.permute.xlu1 %382  ;;  %v399_v13 = vpop.permute.xlu0 %398 }
 0x171   :  { %v394_v16 = vmax.f32 %v364_v46, %v383_v12 }
 0x173   :  { %v410_v20 = vmax.f32 %v394_v16, %v399_v13 }
 0x174   :  { %v415_v14 = vpop.permute.xlu1 %414  ;;  %v417_v17 = vpop.permute.xlu0 %416 }
 0x175   :  { %v426_v25 = vmax.f32 %v410_v20, %v415_v14 }
 0x177   :  { %v454_v31 = vadd.f32 %v437_v8, %v426_v25 }
 0x178   :  { %v385_v15 = vpop.permute.xlu1 %384  ;;  %v403_v22 = vpop.permute.xlu0 %402 }
 0x179   :  { %v395_v18 = vmax.f32 %v367_v49, %v385_v15  ;;  %v458_v37 = vmax.f32 %v454_v31, 0.0 }
 0x17b   :  { %v466_v45 = vmul.f32 %v462_v40, %v458_v37 }
 0x17c   :  { %v401_v19 = vpop.permute.xlu1 %400  ;;  %v419_v29 = vpop.permute.xlu0 %418 }
 0x17d   :  { %v411_v21 = vmax.f32 %v395_v18, %v401_v19  ;;  %v471_v51 = vsel %vm470_vm2, %v466_v45, 0.0 }
 0x17f   :  { %v427_v23 = vmax.f32 %v411_v21, %v417_v17 }
 0x180   :  { %v387_v24 = vpop.permute.xlu1 %386 }
 0x181   :  { %v396_v26 = vmax.f32 %v372_v57, %v387_v24  ;;  %v455_v27 = vadd.f32 %v442_v9, %v427_v23 }
 0x183   :  { %v412_v28 = vmax.f32 %v396_v26, %v403_v22  ;;  %v459_v33 = vmax.f32 %v455_v27, 0.0 }
 0x184   :  { %v389_v30 = vpop.permute.xlu1 %388 }
 0x185   :  { %v428_v32 = vmax.f32 %v412_v28, %v419_v29  ;;  %v397_v39 = vmax.f32 %v375_v61, %v389_v30  ;;  %v467_v42 = vmul.f32 %v463_v35, %v459_v33 }
 0x187   :  { %v456_v34 = vadd.f32 %v447_v10, %v428_v32  ;;  %v472_v48 = vsel %vm470_vm2, %v467_v42, 0.0 }
 0x188   :  { %v405_v36 = vpop.permute.xlu1 %404  ;;  %v473_v54 = vadd.f32 %v472_v48, %v471_v51 }
 0x189   :  { %v460_v38 = vmax.f32 %v456_v34, 0.0  ;;  %v413_v43 = vmax.f32 %v397_v39, %v405_v36 }
 0x18b   :  { %v468_v46 = vmul.f32 %v464_v41, %v460_v38 }
 0x18c   :  { %v421_v44 = vpop.permute.xlu1 %420 }
 0x18d   :  { %v429_v47 = vmax.f32 %v413_v43, %v421_v44  ;;  %v474_v52 = vsel %vm470_vm2, %v468_v46, 0.0  ;;  %v492_v4 = vpop.permute.xlu0 %491 }
 0x18e   :  { %v475_v56 = vadd.f32 %v474_v52, %v473_v54  ;;  %v497_v5 = vrot.slane %v492_v4, %v496_v3 }
 0x18f   :  { %v457_v49 = vadd.f32 %v452_v11, %v429_v47 }
 0x191   :  { %v461_v53 = vmax.f32 %v457_v49, 0.0 }
 0x193   :  { %v469_v55 = vmul.f32 %v465_v50, %v461_v53 }
 0x195   :  { %v476_v57 = vsel %vm470_vm2, %v469_v55, 0.0 }
 0x196   :  { %v477_v58 = vadd.f32 %v476_v57, %v475_v56 }
 0x198   :  { %v478_v59 = vrot.slane %v477_v58, 4 }
 0x19a   :  { %v479_v60 = vadd.f32 %v478_v59, %v477_v58 }
 0x19c   :  { %v480_v61 = vrot.slane %v479_v60, 2 }
 0x19e   :  { %v481_v62 = vadd.f32 %v480_v61, %v479_v60 }
 0x1a0   :  { %v482_v63 = vrot.slane %v481_v62, 1 }
 0x1a2   :  { %v483_v0 = vadd.f32 %v482_v63, %v481_v62 }
 0x1a4   :  { %665 = vmatmul.mubr.msk.f32.vlgmr.msra.gmra.mrb[8].mxu0 %vm470_vm2, %v483_v0 }
 0x277   :  { %v567_v6 = vpop.f32.mrb[8].mxu0 }
 0x278   :  { %v568_v7 = vadd.f32 %v567_v6, %v497_v5  ;;  %v666_v8 = vpop.f32.mrb[9].mxu0 }
 0x27a   :  { %572 = vst.msk [vmem:[#allocation3] sm:$0x1] %vm571_vm3, %v568_v7 }
 0x27b   :  { %730 = shalt.err (!%p727_p4)
}
 0x27c   :  { %s731_s16 = scalar_lea.hbm %s959_s6, 16 }
 0x27d   :  { %p732_p5 = scmp.ne.s32.totalorder %s959_s6, %s731_s16  ;;  %p735_p6 = scmp.lt.u32.totalorder %s731_s16, %s959_s6 }
 0x27f   :  { %p737_p7 = pnand %p735_p6, %p732_p5 }
 0x281   :  { %740 = shalt.err (!%p737_p7)
}
 0x282   :  { %582 = dma.vmem_to_hbm [thread:$0]  %s580_s0, 16, %s959_s6, [#allocation4]  }
 0x283   :  { %741 = dma.done.wait [#allocation4], 16  }
 0x284   :  { %742 = vsyncadd [#allocation4], 4294967280 }
 0x285   :  { %586 = vsyncpa [#allocation4], 1 }

</bundles_post_ra>
